<compile_context>
chip_gen: v5e
topology: v5e:2x2
jax: 0.10.0
libtpu: 0.0.40
codegen_flags: <defaults>
</compile_context>

<pallas_src>
import math

import jax
import jax.numpy as jnp
from jax import lax
from jax.experimental import pallas as pl
from jax.experimental.pallas import tpu as pltpu

# ---------------- configuration (small, consistent with the module) ----------
B = 2            # batch
CIN = 4          # image channels
H = W = 16       # spatial
P = H * W        # pixels per image (256, multiple of 128 -> lane aligned)
F = 32           # image-encoder feature dim
L = 8            # label sequence length
PAD_VALUE = 16   # pad value == number of label classes (k-hot width after drop)
C = PAD_VALUE    # label-logit width
K = 4            # maxnumlabels == cardinality classes
TH = 0.5         # threshold on sigmoid probabilities
TH_LOGIT = math.log(TH / (1.0 - TH))   # == 0.0 ; prob > TH  <=>  logit > TH_LOGIT
OFFSET = 1       # use_empty_set = False
NEG_BIG = -1e30  # "removed" sentinel for iterative top-k

SLAB_ROWS = F + C + K          # 52  (rows 0:F -> encoder, rows F: -> decoder)
SLAB_COLS = F + 1              # 33  (weights | bias column)
OUT_ROWS = K + 2               # K prediction rows + 2 bitcast-loss rows


def setpred_kernel(x_ref, labels_ref, params_ref, out_ref):
    # ---- unpack the single params slab (static slices, one padded VMEM tile) -
    params = params_ref[...]                               # [SLAB_ROWS, SLAB_COLS]
    wenc = params[:F, :CIN]                                # [F, CIN]
    benc = params[:F, CIN:CIN + 1]                         # [F, 1]
    wcat = params[F:, :F]                                  # [C+K, F]
    bcat = params[F:, F:F + 1]                             # [C+K, 1]

    # ---- image encoder (pointwise conv as lane-dense matmul + ReLU) ----------
    # + global average pool as an in-kernel cross-lane sum (XLU slot) ---------
    feats = []
    for b in range(B):                                     # B=2, unrolled
        x_b = x_ref[b]                                     # [CIN, P] lane-dense
        enc_b = jnp.maximum(
            jnp.dot(wenc, x_b, preferred_element_type=jnp.float32) + benc, 0.0)
        feats.append(jnp.sum(enc_b, axis=1, keepdims=True) * (1.0 / P))  # [F, 1]
    feat = jnp.concatenate(feats, axis=1)                  # [F, B]

    # ---- fused FF decoder heads: one matmul for label + cardinality logits ---
    logits = jnp.dot(wcat, feat, preferred_element_type=jnp.float32) + bcat
    label_logits = logits[:C, :]                           # [C, B]
    card_logits = logits[C:, :]                            # [K, B]

    # ---- label2_k_hots, vectorized (no L-loop) -------------------------------
    # hits[c, b*L+l] = (labels[b, l] == c); pad entries (== PAD_VALUE) never hit,
    # which is exactly "scatter into pad_value+1 columns then drop the last".
    labels = labels_ref[...]                               # [1, B*L] int32
    class_iota = lax.broadcasted_iota(jnp.int32, (C, B * L), 0)
    hits = (labels == class_iota).astype(jnp.float32)      # [C, B*L]
    seg_r = lax.broadcasted_iota(jnp.int32, (B * L, B), 0)
    seg_c = lax.broadcasted_iota(jnp.int32, (B * L, B), 1)
    seg = jnp.logical_and(seg_r >= seg_c * L,
                          seg_r < (seg_c + 1) * L).astype(jnp.float32)  # [B*L, B]
    # max-over-seq == clamp(sum-over-seq) since hits are 0/1 (handles duplicates)
    k_hot = jnp.minimum(jnp.dot(hits, seg,
                                preferred_element_type=jnp.float32), 1.0)  # [C, B]

    # ---- label loss: BCE-with-logits, mean reduction over B*C ----------------
    # (log(1+exp(-|x|)) with exp(-|x|) <= 1 is within f32 rounding of log1p here)
    xl = label_logits
    bce = (jnp.maximum(xl, 0.0) - xl * k_hot
           + jnp.log(1.0 + jnp.exp(-jnp.abs(xl))))         # [C, B]
    label_loss = jnp.sum(jnp.sum(bce, axis=0, keepdims=True),
                         axis=1, keepdims=True) * (1.0 / (B * C))  # [1, 1]

    # ---- cardinality loss: cross-entropy, mean reduction ---------------------
    # Target clamped to [0, K-1]: identical for the module's assumed 1..K
    # distinct labels per row; PyTorch CE would error on an all-pad row anyway.
    card_target = jnp.sum(k_hot, axis=0, keepdims=True)    # [1, B]
    tgt = jnp.clip((card_target - float(OFFSET)).astype(jnp.int32), 0, K - 1)
    m = jnp.max(card_logits, axis=0, keepdims=True)        # [1, B]
    lse = m + jnp.log(jnp.sum(jnp.exp(card_logits - m),
                              axis=0, keepdims=True))      # [1, B]
    kiota = lax.broadcasted_iota(jnp.int32, (K, B), 0)
    picked = jnp.sum(jnp.where(kiota == tgt, card_logits, 0.0),
                     axis=0, keepdims=True)                # [1, B]
    card_loss = jnp.sum(lse - picked, axis=1, keepdims=True) * (1.0 / B)  # [1, 1]

    # ---- predictions_to_idxs: top-k + threshold, entirely in logit space -----
    # sigmoid is strictly monotone, so top-k on logits == top-k on probs and
    # prob > TH <=> logit > TH_LOGIT.  Float-equality argmax matches lax.top_k
    # first-occurrence tie-breaking for finite logits (NaN logits unsupported).
    row_iota = lax.broadcasted_iota(jnp.int32, (C, B), 0)
    work = label_logits
    rows = []
    for k in range(K):
        mval = jnp.max(work, axis=0, keepdims=True)        # [1, B]
        idx = jnp.min(jnp.where(work == mval, row_iota, C),
                      axis=0, keepdims=True)               # [1, B] first max
        if k == 0:
            row = idx                                      # mask[:, 0] = 1
        else:
            row = jnp.where(mval > TH_LOGIT, idx, PAD_VALUE)
        rows.append(row)
        work = jnp.where(row_iota == idx, jnp.float32(NEG_BIG), work)
    preds = jnp.concatenate(rows, axis=0).astype(jnp.int32)      # [K, B]

    # ---- single merged output: [preds ; bitcast(losses)] ---------------------
    losses2 = jnp.concatenate([label_loss, card_loss], axis=0)   # [2, 1] f32
    loss_rows = pltpu.bitcast(jnp.broadcast_to(losses2, (2, B)), jnp.int32)
    out_ref[...] = jnp.concatenate([preds, loss_rows], axis=0)   # [K+2, B] int32


def setpred_forward(img_nchw, label_target, params):
    # glue (plain JAX): zero-cost reshapes only — no image transpose pre-pass
    x = img_nchw.reshape(B, CIN, P)                              # [B, CIN, P]
    labels_flat = label_target.reshape(1, B * L).astype(jnp.int32)

    # one lane-padded params slab -> 3 input DMAs total (x, labels, slab)
    slab = jnp.zeros((SLAB_ROWS, SLAB_COLS), dtype=jnp.float32)
    slab = slab.at[:F, :CIN].set(params['wenc'].T)                     # [F, CIN]
    slab = slab.at[:F, CIN:CIN + 1].set(params['benc'].T)              # [F, 1]
    slab = slab.at[F:, :F].set(
        jnp.concatenate([params['wl'], params['wc']], axis=1).T)       # [C+K, F]
    slab = slab.at[F:, F:F + 1].set(
        jnp.concatenate([params['bl'], params['bc']], axis=1).T)       # [C+K, 1]

    vmem = pl.BlockSpec(memory_space=pltpu.MemorySpace.VMEM)
    out = pl.pallas_call(
        setpred_kernel,
        in_specs=[vmem, vmem, vmem],
        out_specs=vmem,
        out_shape=jax.ShapeDtypeStruct((OUT_ROWS, B), jnp.int32),
    )(x, labels_flat, slab)

    preds = out[:K, :].T                                         # [B, K] int32
    loss_vals = lax.bitcast_convert_type(out[K:, 0], jnp.float32)  # [2] f32
    losses = {'label_loss': loss_vals[0],
              'cardinality_loss': loss_vals[1]}
    return losses, preds


def reference_forward(img_nchw, label_target, p):
    # pure-JAX reference of the same forward (for a correctness sanity check)
    x = jnp.transpose(img_nchw, (0, 2, 3, 1)).reshape(B * P, CIN)
    fp = jnp.maximum(x @ p['wenc'] + p['benc'], 0.0)
    feat = fp.reshape(B, P, F).mean(axis=1)
    ll = feat @ p['wl'] + p['bl']
    cl = feat @ p['wc'] + p['bc']
    one_hot = jax.nn.one_hot(label_target, PAD_VALUE + 1)
    k_hot = one_hot.max(axis=1)[:, :C]
    bce = jnp.maximum(ll, 0.0) - ll * k_hot + jnp.log1p(jnp.exp(-jnp.abs(ll)))
    label_loss = bce.mean()
    tgt = (k_hot.sum(axis=1) - OFFSET).astype(jnp.int32)
    card_loss = jnp.mean(jax.nn.logsumexp(cl, axis=1)
                         - jnp.take_along_axis(cl, tgt[:, None], axis=1)[:, 0])
    probs = jax.nn.sigmoid(ll)
    vals, idxs = lax.top_k(probs, K)
    mask = (vals > TH).at[:, 0].set(True)
    preds = jnp.where(mask, idxs, PAD_VALUE)
    return label_loss, card_loss, preds


if __name__ == "__main__":
    key = jax.random.PRNGKey(0)
    k_img, k_we, k_be, k_wl, k_bl, k_wc, k_bc = jax.random.split(key, 7)

    img = jax.random.normal(k_img, (B, CIN, H, W), dtype=jnp.float32)
    # label sequences padded with PAD_VALUE; distinct-label counts in [1, K]
    label_target = jnp.array(
        [[3, 7, 7, PAD_VALUE, PAD_VALUE, PAD_VALUE, PAD_VALUE, PAD_VALUE],
         [1, 5, 9, 11, PAD_VALUE, PAD_VALUE, PAD_VALUE, PAD_VALUE]],
        dtype=jnp.int32)

    params = {
        'wenc': 0.5 * jax.random.normal(k_we, (CIN, F), dtype=jnp.float32),
        'benc': 0.1 * jax.random.normal(k_be, (1, F), dtype=jnp.float32),
        'wl':   0.5 * jax.random.normal(k_wl, (F, C), dtype=jnp.float32),
        'bl':   0.1 * jax.random.normal(k_bl, (1, C), dtype=jnp.float32),
        'wc':   0.5 * jax.random.normal(k_wc, (F, K), dtype=jnp.float32),
        'bc':   0.1 * jax.random.normal(k_bc, (1, K), dtype=jnp.float32),
    }

    losses, preds = setpred_forward(img, label_target, params)
    jax.block_until_ready(losses['label_loss'])
    jax.block_until_ready(losses['cardinality_loss'])
    jax.block_until_ready(preds)

    # sanity check against pure-JAX reference
    ref_ll, ref_cl, ref_pred = reference_forward(img, label_target, params)
    assert jnp.allclose(losses['label_loss'], ref_ll, atol=1e-3, rtol=1e-3)
    assert jnp.allclose(losses['cardinality_loss'], ref_cl, atol=1e-3, rtol=1e-3)
    assert preds.shape == (B, K) and preds.dtype == jnp.int32
    assert bool(jnp.all((preds >= 0) & (preds <= PAD_VALUE)))
    assert bool(jnp.all(preds == ref_pred))

    print("KERNEL_OK")
</pallas_src>

<mosaic_0001>
module attributes {stable_mosaic.version = 11 : i64} {
  func.func @setpred_kernel(%arg0: memref<2x4x256xf32, #tpu.memory_space<vmem>>, %arg1: memref<1x16xi32, #tpu.memory_space<vmem>>, %arg2: memref<52x33xf32, #tpu.memory_space<vmem>>, %arg3: memref<6x2xi32, #tpu.memory_space<vmem>>) attributes {dimension_semantics = [], scalar_prefetch = 0 : i64, scratch_operands = 0 : i64, tpu.core_type = #tpu.core_type<tc>} {
    %c0 = arith.constant 0 : index
    %c0_0 = arith.constant 0 : index
    %0 = vector.load %arg2[%c0, %c0_0] : memref<52x33xf32, #tpu.memory_space<vmem>>, vector<52x33xf32>
    %1 = vector.extract_strided_slice %0 {offsets = [0, 0], sizes = [32, 4], strides = [1, 1]} : vector<52x33xf32> to vector<32x4xf32>
    %2 = vector.extract_strided_slice %0 {offsets = [0, 4], sizes = [32, 1], strides = [1, 1]} : vector<52x33xf32> to vector<32x1xf32>
    %3 = vector.extract_strided_slice %0 {offsets = [32, 0], sizes = [20, 32], strides = [1, 1]} : vector<52x33xf32> to vector<20x32xf32>
    %4 = vector.extract_strided_slice %0 {offsets = [32, 32], sizes = [20, 1], strides = [1, 1]} : vector<52x33xf32> to vector<20x1xf32>
    %c0_1 = arith.constant 0 : index
    %c0_2 = arith.constant 0 : index
    %c0_3 = arith.constant 0 : index
    %5 = vector.load %arg0[%c0_1, %c0_2, %c0_3] : memref<2x4x256xf32, #tpu.memory_space<vmem>>, vector<1x4x256xf32>
    %6 = vector.shape_cast %5 : vector<1x4x256xf32> to vector<4x256xf32>
    %cst = arith.constant dense<0.000000e+00> : vector<32x256xf32>
    %7 = tpu.matmul %1, %6, %cst {dimension_numbers = #tpu.dot_dimension_numbers<[1], [0], [0], [1], [0, 0, 1, 1], [], []>} : vector<32x4xf32>, vector<4x256xf32>, vector<32x256xf32> -> vector<32x256xf32>
    %8 = vector.broadcast %2 : vector<32x1xf32> to vector<32x256xf32>
    %9 = arith.addf %7, %8 : vector<32x256xf32>
    %cst_4 = arith.constant 0.000000e+00 : f32
    %10 = vector.broadcast %cst_4 : f32 to vector<32x256xf32>
    %11 = arith.maximumf %9, %10 : vector<32x256xf32>
    %cst_5 = arith.constant dense<0.000000e+00> : vector<32xf32>
    %12 = vector.multi_reduction <add>, %11, %cst_5 [1] : vector<32x256xf32> to vector<32xf32>
    %13 = vector.shape_cast %12 : vector<32xf32> to vector<32x1xf32>
    %cst_6 = arith.constant 3.906250e-03 : f32
    %14 = vector.broadcast %cst_6 : f32 to vector<32x1xf32>
    %15 = arith.mulf %13, %14 : vector<32x1xf32>
    %c1 = arith.constant 1 : index
    %c0_7 = arith.constant 0 : index
    %c0_8 = arith.constant 0 : index
    %16 = vector.load %arg0[%c1, %c0_7, %c0_8] : memref<2x4x256xf32, #tpu.memory_space<vmem>>, vector<1x4x256xf32>
    %17 = vector.shape_cast %16 : vector<1x4x256xf32> to vector<4x256xf32>
    %cst_9 = arith.constant dense<0.000000e+00> : vector<32x256xf32>
    %18 = tpu.matmul %1, %17, %cst_9 {dimension_numbers = #tpu.dot_dimension_numbers<[1], [0], [0], [1], [0, 0, 1, 1], [], []>} : vector<32x4xf32>, vector<4x256xf32>, vector<32x256xf32> -> vector<32x256xf32>
    %19 = vector.broadcast %2 : vector<32x1xf32> to vector<32x256xf32>
    %20 = arith.addf %18, %19 : vector<32x256xf32>
    %cst_10 = arith.constant 0.000000e+00 : f32
    %21 = vector.broadcast %cst_10 : f32 to vector<32x256xf32>
    %22 = arith.maximumf %20, %21 : vector<32x256xf32>
    %cst_11 = arith.constant dense<0.000000e+00> : vector<32xf32>
    %23 = vector.multi_reduction <add>, %22, %cst_11 [1] : vector<32x256xf32> to vector<32xf32>
    %24 = vector.shape_cast %23 : vector<32xf32> to vector<32x1xf32>
    %cst_12 = arith.constant 3.906250e-03 : f32
    %25 = vector.broadcast %cst_12 : f32 to vector<32x1xf32>
    %26 = arith.mulf %24, %25 : vector<32x1xf32>
    %27 = tpu.concatenate %15, %26 in 1 : vector<32x1xf32>, vector<32x1xf32> -> vector<32x2xf32>
    %cst_13 = arith.constant dense<0.000000e+00> : vector<20x2xf32>
    %28 = tpu.matmul %3, %27, %cst_13 {dimension_numbers = #tpu.dot_dimension_numbers<[1], [0], [0], [1], [0, 0, 1, 1], [], []>} : vector<20x32xf32>, vector<32x2xf32>, vector<20x2xf32> -> vector<20x2xf32>
    %29 = vector.broadcast %4 : vector<20x1xf32> to vector<20x2xf32>
    %30 = arith.addf %28, %29 : vector<20x2xf32>
    %31 = vector.extract_strided_slice %30 {offsets = [0, 0], sizes = [16, 2], strides = [1, 1]} : vector<20x2xf32> to vector<16x2xf32>
    %32 = vector.extract_strided_slice %30 {offsets = [16, 0], sizes = [4, 2], strides = [1, 1]} : vector<20x2xf32> to vector<4x2xf32>
    %c0_14 = arith.constant 0 : index
    %c0_15 = arith.constant 0 : index
    %33 = vector.load %arg1[%c0_14, %c0_15] : memref<1x16xi32, #tpu.memory_space<vmem>>, vector<1x16xi32>
    %34 = tpu.iota {dimensions = array<i32: 0>} : vector<16x16xi32>
    %35 = vector.broadcast %33 : vector<1x16xi32> to vector<16x16xi32>
    %36 = arith.cmpi eq, %35, %34 : vector<16x16xi32>
    %37 = arith.extui %36 : vector<16x16xi1> to vector<16x16xi32>
    %38 = arith.sitofp %37 : vector<16x16xi32> to vector<16x16xf32>
    %39 = tpu.iota {dimensions = array<i32: 0>} : vector<16x2xi32>
    %40 = tpu.iota {dimensions = array<i32: 1>} : vector<16x2xi32>
    %c8_i32 = arith.constant 8 : i32
    %41 = vector.broadcast %c8_i32 : i32 to vector<16x2xi32>
    %42 = arith.muli %40, %41 : vector<16x2xi32>
    %43 = arith.cmpi sge, %39, %42 : vector<16x2xi32>
    %c1_i32 = arith.constant 1 : i32
    %44 = vector.broadcast %c1_i32 : i32 to vector<16x2xi32>
    %45 = arith.addi %40, %44 : vector<16x2xi32>
    %c8_i32_16 = arith.constant 8 : i32
    %46 = vector.broadcast %c8_i32_16 : i32 to vector<16x2xi32>
    %47 = arith.muli %45, %46 : vector<16x2xi32>
    %48 = arith.cmpi slt, %39, %47 : vector<16x2xi32>
    %49 = arith.andi %43, %48 : vector<16x2xi1>
    %50 = arith.extui %49 : vector<16x2xi1> to vector<16x2xi32>
    %51 = arith.sitofp %50 : vector<16x2xi32> to vector<16x2xf32>
    %cst_17 = arith.constant dense<0.000000e+00> : vector<16x2xf32>
    %52 = tpu.matmul %38, %51, %cst_17 {dimension_numbers = #tpu.dot_dimension_numbers<[1], [0], [0], [1], [0, 0, 1, 1], [], []>} : vector<16x16xf32>, vector<16x2xf32>, vector<16x2xf32> -> vector<16x2xf32>
    %cst_18 = arith.constant 1.000000e+00 : f32
    %53 = vector.broadcast %cst_18 : f32 to vector<16x2xf32>
    %54 = arith.minimumf %52, %53 : vector<16x2xf32>
    %cst_19 = arith.constant 0.000000e+00 : f32
    %55 = vector.broadcast %cst_19 : f32 to vector<16x2xf32>
    %56 = arith.maximumf %31, %55 : vector<16x2xf32>
    %57 = arith.mulf %31, %54 : vector<16x2xf32>
    %58 = arith.subf %56, %57 : vector<16x2xf32>
    %59 = math.absf %31 : vector<16x2xf32>
    %cst_20 = arith.constant 0.000000e+00 : f32
    %60 = vector.broadcast %cst_20 : f32 to vector<16x2xf32>
    %61 = arith.subf %60, %59 : vector<16x2xf32>
    %62 = math.exp %61 : vector<16x2xf32>
    %cst_21 = arith.constant 1.000000e+00 : f32
    %63 = vector.broadcast %cst_21 : f32 to vector<16x2xf32>
    %64 = arith.addf %63, %62 : vector<16x2xf32>
    %65 = math.log %64 : vector<16x2xf32>
    %66 = arith.addf %58, %65 : vector<16x2xf32>
    %cst_22 = arith.constant dense<0.000000e+00> : vector<2xf32>
    %67 = vector.multi_reduction <add>, %66, %cst_22 [0] : vector<16x2xf32> to vector<2xf32>
    %68 = vector.shape_cast %67 : vector<2xf32> to vector<1x2xf32>
    %cst_23 = arith.constant dense<0.000000e+00> : vector<1xf32>
    %69 = vector.multi_reduction <add>, %68, %cst_23 [1] : vector<1x2xf32> to vector<1xf32>
    %70 = vector.shape_cast %69 : vector<1xf32> to vector<1x1xf32>
    %cst_24 = arith.constant 3.125000e-02 : f32
    %71 = vector.broadcast %cst_24 : f32 to vector<1x1xf32>
    %72 = arith.mulf %70, %71 : vector<1x1xf32>
    %cst_25 = arith.constant dense<0.000000e+00> : vector<2xf32>
    %73 = vector.multi_reduction <add>, %54, %cst_25 [0] : vector<16x2xf32> to vector<2xf32>
    %74 = vector.shape_cast %73 : vector<2xf32> to vector<1x2xf32>
    %cst_26 = arith.constant 1.000000e+00 : f32
    %75 = vector.broadcast %cst_26 : f32 to vector<1x2xf32>
    %76 = arith.subf %74, %75 : vector<1x2xf32>
    %77 = arith.fptosi %76 : vector<1x2xf32> to vector<1x2xi32>
    %c0_i32 = arith.constant 0 : i32
    %c3_i32 = arith.constant 3 : i32
    %78 = vector.broadcast %c0_i32 : i32 to vector<1x2xi32>
    %79 = arith.maxsi %78, %77 : vector<1x2xi32>
    %80 = vector.broadcast %c3_i32 : i32 to vector<1x2xi32>
    %81 = arith.minsi %80, %79 : vector<1x2xi32>
    %cst_27 = arith.constant dense<0xFF800000> : vector<2xf32>
    %82 = vector.multi_reduction <maximumf>, %32, %cst_27 [0] : vector<4x2xf32> to vector<2xf32>
    %83 = vector.shape_cast %82 : vector<2xf32> to vector<1x2xf32>
    %84 = vector.broadcast %83 : vector<1x2xf32> to vector<4x2xf32>
    %85 = arith.subf %32, %84 : vector<4x2xf32>
    %86 = math.exp %85 : vector<4x2xf32>
    %cst_28 = arith.constant dense<0.000000e+00> : vector<2xf32>
    %87 = vector.multi_reduction <add>, %86, %cst_28 [0] : vector<4x2xf32> to vector<2xf32>
    %88 = vector.shape_cast %87 : vector<2xf32> to vector<1x2xf32>
    %89 = math.log %88 : vector<1x2xf32>
    %90 = arith.addf %83, %89 : vector<1x2xf32>
    %91 = tpu.iota {dimensions = array<i32: 0>} : vector<4x2xi32>
    %92 = vector.broadcast %81 : vector<1x2xi32> to vector<4x2xi32>
    %93 = arith.cmpi eq, %91, %92 : vector<4x2xi32>
    %cst_29 = arith.constant 0.000000e+00 : f32
    %94 = vector.broadcast %cst_29 : f32 to vector<4x2xf32>
    %95 = arith.select %93, %32, %94 : vector<4x2xi1>, vector<4x2xf32>
    %cst_30 = arith.constant dense<0.000000e+00> : vector<2xf32>
    %96 = vector.multi_reduction <add>, %95, %cst_30 [0] : vector<4x2xf32> to vector<2xf32>
    %97 = vector.shape_cast %96 : vector<2xf32> to vector<1x2xf32>
    %98 = arith.subf %90, %97 : vector<1x2xf32>
    %cst_31 = arith.constant dense<0.000000e+00> : vector<1xf32>
    %99 = vector.multi_reduction <add>, %98, %cst_31 [1] : vector<1x2xf32> to vector<1xf32>
    %100 = vector.shape_cast %99 : vector<1xf32> to vector<1x1xf32>
    %cst_32 = arith.constant 5.000000e-01 : f32
    %101 = vector.broadcast %cst_32 : f32 to vector<1x1xf32>
    %102 = arith.mulf %100, %101 : vector<1x1xf32>
    %103 = tpu.iota {dimensions = array<i32: 0>} : vector<16x2xi32>
    %cst_33 = arith.constant dense<0xFF800000> : vector<2xf32>
    %104 = vector.multi_reduction <maximumf>, %31, %cst_33 [0] : vector<16x2xf32> to vector<2xf32>
    %105 = vector.shape_cast %104 : vector<2xf32> to vector<1x2xf32>
    %106 = vector.broadcast %105 : vector<1x2xf32> to vector<16x2xf32>
    %107 = arith.cmpf oeq, %31, %106 : vector<16x2xf32>
    %c16_i32 = arith.constant 16 : i32
    %108 = vector.broadcast %c16_i32 : i32 to vector<16x2xi32>
    %109 = arith.select %107, %103, %108 : vector<16x2xi1>, vector<16x2xi32>
    %cst_34 = arith.constant dense<2147483647> : vector<2xi32>
    %110 = vector.multi_reduction <minsi>, %109, %cst_34 [0] : vector<16x2xi32> to vector<2xi32>
    %111 = vector.shape_cast %110 : vector<2xi32> to vector<1x2xi32>
    %112 = vector.broadcast %111 : vector<1x2xi32> to vector<16x2xi32>
    %113 = arith.cmpi eq, %103, %112 : vector<16x2xi32>
    %cst_35 = arith.constant -1.000000e+30 : f32
    %114 = vector.broadcast %cst_35 : f32 to vector<16x2xf32>
    %115 = arith.select %113, %114, %31 : vector<16x2xi1>, vector<16x2xf32>
    %cst_36 = arith.constant dense<0xFF800000> : vector<2xf32>
    %116 = vector.multi_reduction <maximumf>, %115, %cst_36 [0] : vector<16x2xf32> to vector<2xf32>
    %117 = vector.shape_cast %116 : vector<2xf32> to vector<1x2xf32>
    %118 = vector.broadcast %117 : vector<1x2xf32> to vector<16x2xf32>
    %119 = arith.cmpf oeq, %115, %118 : vector<16x2xf32>
    %c16_i32_37 = arith.constant 16 : i32
    %120 = vector.broadcast %c16_i32_37 : i32 to vector<16x2xi32>
    %121 = arith.select %119, %103, %120 : vector<16x2xi1>, vector<16x2xi32>
    %cst_38 = arith.constant dense<2147483647> : vector<2xi32>
    %122 = vector.multi_reduction <minsi>, %121, %cst_38 [0] : vector<16x2xi32> to vector<2xi32>
    %123 = vector.shape_cast %122 : vector<2xi32> to vector<1x2xi32>
    %cst_39 = arith.constant 0.000000e+00 : f32
    %124 = vector.broadcast %cst_39 : f32 to vector<1x2xf32>
    %125 = arith.cmpf ogt, %117, %124 : vector<1x2xf32>
    %c16_i32_40 = arith.constant 16 : i32
    %126 = vector.broadcast %c16_i32_40 : i32 to vector<1x2xi32>
    %127 = arith.select %125, %123, %126 : vector<1x2xi1>, vector<1x2xi32>
    %128 = vector.broadcast %123 : vector<1x2xi32> to vector<16x2xi32>
    %129 = arith.cmpi eq, %103, %128 : vector<16x2xi32>
    %cst_41 = arith.constant -1.000000e+30 : f32
    %130 = vector.broadcast %cst_41 : f32 to vector<16x2xf32>
    %131 = arith.select %129, %130, %115 : vector<16x2xi1>, vector<16x2xf32>
    %cst_42 = arith.constant dense<0xFF800000> : vector<2xf32>
    %132 = vector.multi_reduction <maximumf>, %131, %cst_42 [0] : vector<16x2xf32> to vector<2xf32>
    %133 = vector.shape_cast %132 : vector<2xf32> to vector<1x2xf32>
    %134 = vector.broadcast %133 : vector<1x2xf32> to vector<16x2xf32>
    %135 = arith.cmpf oeq, %131, %134 : vector<16x2xf32>
    %c16_i32_43 = arith.constant 16 : i32
    %136 = vector.broadcast %c16_i32_43 : i32 to vector<16x2xi32>
    %137 = arith.select %135, %103, %136 : vector<16x2xi1>, vector<16x2xi32>
    %cst_44 = arith.constant dense<2147483647> : vector<2xi32>
    %138 = vector.multi_reduction <minsi>, %137, %cst_44 [0] : vector<16x2xi32> to vector<2xi32>
    %139 = vector.shape_cast %138 : vector<2xi32> to vector<1x2xi32>
    %cst_45 = arith.constant 0.000000e+00 : f32
    %140 = vector.broadcast %cst_45 : f32 to vector<1x2xf32>
    %141 = arith.cmpf ogt, %133, %140 : vector<1x2xf32>
    %c16_i32_46 = arith.constant 16 : i32
    %142 = vector.broadcast %c16_i32_46 : i32 to vector<1x2xi32>
    %143 = arith.select %141, %139, %142 : vector<1x2xi1>, vector<1x2xi32>
    %144 = vector.broadcast %139 : vector<1x2xi32> to vector<16x2xi32>
    %145 = arith.cmpi eq, %103, %144 : vector<16x2xi32>
    %cst_47 = arith.constant -1.000000e+30 : f32
    %146 = vector.broadcast %cst_47 : f32 to vector<16x2xf32>
    %147 = arith.select %145, %146, %131 : vector<16x2xi1>, vector<16x2xf32>
    %cst_48 = arith.constant dense<0xFF800000> : vector<2xf32>
    %148 = vector.multi_reduction <maximumf>, %147, %cst_48 [0] : vector<16x2xf32> to vector<2xf32>
    %149 = vector.shape_cast %148 : vector<2xf32> to vector<1x2xf32>
    %150 = vector.broadcast %149 : vector<1x2xf32> to vector<16x2xf32>
    %151 = arith.cmpf oeq, %147, %150 : vector<16x2xf32>
    %c16_i32_49 = arith.constant 16 : i32
    %152 = vector.broadcast %c16_i32_49 : i32 to vector<16x2xi32>
    %153 = arith.select %151, %103, %152 : vector<16x2xi1>, vector<16x2xi32>
    %cst_50 = arith.constant dense<2147483647> : vector<2xi32>
    %154 = vector.multi_reduction <minsi>, %153, %cst_50 [0] : vector<16x2xi32> to vector<2xi32>
    %155 = vector.shape_cast %154 : vector<2xi32> to vector<1x2xi32>
    %cst_51 = arith.constant 0.000000e+00 : f32
    %156 = vector.broadcast %cst_51 : f32 to vector<1x2xf32>
    %157 = arith.cmpf ogt, %149, %156 : vector<1x2xf32>
    %c16_i32_52 = arith.constant 16 : i32
    %158 = vector.broadcast %c16_i32_52 : i32 to vector<1x2xi32>
    %159 = arith.select %157, %155, %158 : vector<1x2xi1>, vector<1x2xi32>
    %160 = tpu.concatenate %111, %127, %143, %159 in 0 : vector<1x2xi32>, vector<1x2xi32>, vector<1x2xi32>, vector<1x2xi32> -> vector<4x2xi32>
    %161 = tpu.concatenate %72, %102 in 0 : vector<1x1xf32>, vector<1x1xf32> -> vector<2x1xf32>
    %162 = vector.shape_cast %161 : vector<2x1xf32> to vector<2x1xf32>
    %163 = vector.broadcast %162 : vector<2x1xf32> to vector<2x2xf32>
    %164 = tpu.bitcast %163 : vector<2x2xf32> -> vector<2x2xi32>
    %165 = tpu.concatenate %160, %164 in 0 : vector<4x2xi32>, vector<2x2xi32> -> vector<6x2xi32>
    %c0_53 = arith.constant 0 : index
    %c0_54 = arith.constant 0 : index
    %166 = vector.load %arg3[%c0_53, %c0_54] : memref<6x2xi32, #tpu.memory_space<vmem>>, vector<6x2xi32>
    tpu.vector_store %arg3[%c0_53, %c0_54], %165 {strides = array<i32>} : memref<6x2xi32, #tpu.memory_space<vmem>>, vector<6x2xi32>,
    return
  }
}

</mosaic_0001>

<bundles_post_ra>
// kernel: tpu_custom_call.1
= control target key start
LH: loop header
LB: loop body
LE: loop exit
PB: predicated region body
PF: predicated region fallthrough
CT: control target
= control target key end

     0   :  { %v635_v1 = vmov 4   ;;  %vm55_vm0 = vcmask 1043456   ;;  %vm46_vm1 = vcmask 31744   ;;  %vm313_vm9 = vcmask 130048   ;;  %s803_s0 = inlined_call_operand.vmem [shape: f32[2,4,256], index: 0, kind: input, shape index: {}]   ;;  %s804_s2 = inlined_call_operand.vmem [shape: f32[52,33], index: 2, kind: input, shape index: {}]   ;;  %s805_s1 = inlined_call_operand.vmem [shape: s32[1,16], index: 1, kind: input, shape index: {}]   ;;  %s806_s3 = inlined_call_operand.vmem [shape: s32[6,2], index: 3, kind: output, shape index: {}]  }
   0x1   :  { %v21_v0 = vld [vmem:[%s803_s0] sm:$0xff]  ;;  %617 = vset.pattern.permute.xlu1 %v635_v1  ;;  %616 = vset.pattern.permute.xlu0 %v635_v1  ;;  %v17_v2 = vld [vmem:[%s804_s2 + $0x18] sm:$0xff]  ;;  %v15_v3 = vld [vmem:[%s804_s2 + $0x8] sm:$0xff]  ;;  %vm234_vm11 = vcmask 7168   ;;  %vm254_vm12 = vcmask 261120   ;;  %vm367_vm13 = vcmask 15360  }
   0x2   :  { %43 = vst [vmem:[#allocation1] ss:$2 sm:$0xff] %v21_v0  ;;  %29 = vperm.xlu1 %617, %v15_v3   ;;  %39 = vperm.xlu0 %616, %v17_v2   ;;  %v582_v4 = vld [vmem:[%s803_s0 + $0x8] sm:$0xff]  ;;  %v14_v5 = vld [vmem:[%s804_s2] sm:$0xff]  ;;  %v16_v8 = vld [vmem:[%s804_s2 + $0x10] sm:$0xff]  ;;  %vm396_vm15 = vcmask 11264  }
   0x9   :  { %v44_v6 = vld.sshfl [vmem:[#allocation1] sm:$0xff pattern:$0x75316420]  ;;  %v45_v7 = vld.sshfl [vmem:[#allocation1 + $0x8] sm:$0xff pattern:$0x75316420] }
   0xa   :  { %572 = vmatpush.msk.msra.mxu0 %vm55_vm0, %v44_v6  ;;  %605 = vmatpush.msk.msra.mxu2 %vm55_vm0, %v44_v6  ;;  %145 = vst [vmem:[#allocation1] ss:$2 sm:$0xff] %v582_v4 }
   0xb   :  { %577 = vmatpush.msk.msra.mxu1 %vm55_vm0, %v45_v7  ;;  %573 = vmatmul.msk.f32.vlgmr.msra.gmra.mxu0 %vm46_vm1, %v14_v5  ;;  %v288_v7 = vlaneseq }
   0xc   :  { %576 = vmatmul.msk.f32.vlgmr.msra.gmra.mxu2 %vm46_vm1, %v17_v2  ;;  %578 = vmatmul.msk.f32.vlgmr.msra.gmra.mxu1 %vm46_vm1, %v14_v5 }
   0xd   :  { %24 = vperm.xlu1 %617, %v14_v5   ;;  %34 = vperm.xlu0 %616, %v16_v8  }
  0x11   :  { %v146_v9 = vld.sshfl [vmem:[#allocation1] sm:$0xff pattern:$0x75316420]  ;;  %v147_v10 = vld.sshfl [vmem:[#allocation1 + $0x8] sm:$0xff pattern:$0x75316420] }
  0x12   :  { %583 = vmatpush.msk.msrb.mxu2 %vm55_vm0, %v146_v9  ;;  %588 = vmatpush.msk.msra.mxu3 %vm55_vm0, %v147_v10  ;;  %v699_v9 = vshrl.u32 %v288_v7, 7 }
  0x13   :  { %574 = vmatmul.msk.f32.gmra.mxu0 %vm46_vm1, %v15_v3  ;;  %589 = vmatmul.msk.f32.vlgmr.msra.gmra.mxu3 %vm46_vm1, %v14_v5 }
  0x14   :  { %579 = vmatmul.msk.f32.gmra.mxu1 %vm46_vm1, %v15_v3  ;;  %584 = vmatmul.msk.f32.vlgmr.msrb.gmra.mxu2 %vm46_vm1, %v14_v5 }
  0x1b   :  { %575 = vmatmul.msk.f32.gmra.mxu0 %vm46_vm1, %v16_v8  ;;  %590 = vmatmul.msk.f32.gmra.mxu3 %vm46_vm1, %v15_v3 }
  0x1c   :  { %580 = vmatmul.msk.f32.gmra.mxu1 %vm46_vm1, %v16_v8  ;;  %585 = vmatmul.msk.f32.gmra.mxu2 %vm46_vm1, %v15_v3 }
  0x23   :  { %591 = vmatmul.msk.f32.gmra.mxu3 %vm46_vm1, %v16_v8 }
  0x24   :  { %581 = vmatmul.msk.f32.gmra.mxu1 %vm46_vm1, %v17_v2  ;;  %586 = vmatmul.msk.f32.gmra.mxu2 %vm46_vm1, %v16_v8  ;;  %v299_v8 = vand.u32 127, %v288_v7 }
  0x26   :  { %v303_v10 = vadd.s32 1, %v299_v8 }
  0x2b   :  { %592 = vmatmul.msk.f32.gmra.mxu3 %vm46_vm1, %v17_v2 }
  0x2c   :  { %587 = vmatmul.msk.f32.gmra.mxu2 %vm46_vm1, %v17_v2 }
  0x74   :  { %v40_v13 = vpop.permute.xlu0 %39  ;;  %v30_v34 = vpop.permute.xlu1 %29 }
  0x7f   :  { %v35_v18 = vpop.permute.xlu0 %34  ;;  %v25_v52 = vpop.permute.xlu1 %24 }
  0x88   :  { %v77_v11 = vpop.f32.mrf.mxu0 }
  0x89   :  { %v106_v12 = vpop.f32.mrf.mxu1  ;;  %v78_v53 = vadd.f32 %v77_v11, %v25_v52  ;;  %v702_v11 = vadd.s32 8, %v699_v9 }
  0x8a   :  { %v107_v54 = vadd.f32 %v106_v12, %v25_v52  ;;  %v300_v12 = vmul.u32 8, %v299_v8 }
  0x8b   :  { %v118_v56 = vmax.f32 %v78_v53, 0.0 }
  0x8c   :  { %v119_v57 = vmax.f32 %v107_v54, 0.0  ;;  %vm302_vm2 = vcmp.ge.s32.totalorder %v702_v11, %v300_v12  ;;  %vm301_vm5 = vcmp.ge.s32.totalorder %v699_v9, %v300_v12 }
  0x8e   :  { %v126_v62 = vadd.f32 %v119_v57, %v118_v56 }
  0x8f   :  { %v86_v14 = vpop.f32.mrf.mxu2 }
  0x90   :  { %v80_v15 = vpop.f32.mrf.mxu0  ;;  %v87_v28 = vadd.f32 %v86_v14, %v40_v13  ;;  %v622_v14 = vld [vmem:[%s805_s1] ss:$0 sm:$0xff] }
  0x91   :  { %v109_v16 = vpop.f32.mrf.mxu1  ;;  %v81_v35 = vadd.f32 %v80_v15, %v30_v34  ;;  %v636_v15 = vmov 1.0   ;;  %vm292_vm8 = vcmp.eq.s32.totalorder %v622_v14, %v699_v9  ;;  %vm293_vm10 = vcmp.eq.s32.totalorder %v622_v14, %v702_v11 }
  0x92   :  { %v124_v32 = vmax.f32 %v87_v28, 0.0  ;;  %v110_v36 = vadd.f32 %v109_v16, %v30_v34  ;;  %v637_v16 = vmov 0.0  }
  0x93   :  { %v120_v43 = vmax.f32 %v81_v35, 0.0 }
  0x94   :  { %v121_v44 = vmax.f32 %v110_v36, 0.0 }
  0x96   :  { %v198_v17 = vpop.f32.mrf.mxu3  ;;  %v129_v49 = vadd.f32 %v121_v44, %v120_v43 }
  0x97   :  { %v169_v19 = vpop.f32.mrf.mxu2  ;;  %v199_v2 = vadd.f32 %v198_v17, %v25_v52  ;;  %v596_v17 = vsel %vm292_vm8, 1.0, %v637_v16 }
  0x98   :  { %v83_v20 = vpop.f32.mrf.mxu0  ;;  %v170_v1 = vadd.f32 %v169_v19, %v25_v52  ;;  %v597_v19 = vsel %vm293_vm10, 1.0, %v637_v16 }
  0x99   :  { %v84_v21 = vadd.f32 %v83_v20, %v35_v18  ;;  %v112_v22 = vpop.f32.mrf.mxu1  ;;  %v211_v5 = vmax.f32 %v199_v2, 0.0 }
  0x9a   :  { %v113_v23 = vadd.f32 %v112_v22, %v35_v18  ;;  %v210_v4 = vmax.f32 %v170_v1, 0.0 }
  0x9b   :  { %v122_v24 = vmax.f32 %v84_v21, 0.0 }
  0x9c   :  { %v123_v25 = vmax.f32 %v113_v23, 0.0  ;;  %v218_v6 = vadd.f32 %v211_v5, %v210_v4 }
  0x9e   :  { %v201_v26 = vpop.f32.mrf.mxu3  ;;  %v132_v27 = vadd.f32 %v123_v25, %v122_v24  ;;  %v19_v24 = vld [vmem:[%s804_s2 + $0x28] sm:$0xff]  ;;  %v20_v25 = vld [vmem:[%s804_s2 + $0x30] sm:$0xf] }
  0x9f   :  { %v172_v29 = vpop.f32.mrf.mxu2  ;;  %v202_v48 = vadd.f32 %v201_v26, %v30_v34  ;;  %v638_v26 = vmov 32  }
  0xa0   :  { %133 = vadd.xlane.f32.xlu0 %v132_v27  ;;  %v173_v47 = vadd.f32 %v172_v29, %v30_v34  ;;  %620 = vset.pattern.permute.xlu1 %v638_v26  ;;  %v18_v29 = vld [vmem:[%s804_s2 + $0x20] sm:$0xff] }
  0xa1   :  { %v115_v30 = vpop.f32.mrf.mxu1  ;;  %v213_v51 = vmax.f32 %v202_v48, 0.0  ;;  %619 = vset.pattern.permute.xlu0 %v638_v26  ;;  %618 = vset.pattern.permute.xlu2 %v638_v26 }
  0xa2   :  { %v116_v31 = vadd.f32 %v115_v30, %v40_v13  ;;  %v212_v50 = vmax.f32 %v173_v47, 0.0 }
  0xa4   :  { %v125_v33 = vmax.f32 %v116_v31, 0.0  ;;  %v221_v55 = vadd.f32 %v213_v51, %v212_v50 }
  0xa6   :  { %v204_v37 = vpop.f32.mrf.mxu3  ;;  %v135_v38 = vadd.f32 %v125_v33, %v124_v32 }
  0xa7   :  { %v175_v39 = vpop.f32.mrf.mxu2  ;;  %v205_v40 = vadd.f32 %v204_v37, %v35_v18 }
  0xa8   :  { %v176_v41 = vadd.f32 %v175_v39, %v35_v18  ;;  %136 = vadd.xlane.f32.xlu2 %v135_v38 }
  0xa9   :  { %v215_v42 = vmax.f32 %v205_v40, 0.0 }
  0xaa   :  { %v214_v45 = vmax.f32 %v176_v41, 0.0 }
  0xac   :  { %v224_v46 = vadd.f32 %v215_v42, %v214_v45 }
  0xae   :  { %225 = vadd.xlane.f32.xlu1 %v224_v46  ;;  %v207_v59 = vpop.f32.mrf.mxu3 }
  0xaf   :  { %v178_v58 = vpop.f32.mrf.mxu2  ;;  %v208_v61 = vadd.f32 %v207_v59, %v40_v13 }
  0xb0   :  { %130 = vadd.xlane.f32.xlu2 %v129_v49  ;;  %v179_v60 = vadd.f32 %v178_v58, %v40_v13  ;;  %v304_v13 = vmul.u32 8, %v303_v10 }
  0xb1   :  { %v217_v0 = vmax.f32 %v208_v61, 0.0 }
  0xb2   :  { %v216_v63 = vmax.f32 %v179_v60, 0.0  ;;  %vm306_vm3 = vcmp.lt.s32.totalorder %v702_v11, %v304_v13  ;;  %vm305_vm6 = vcmp.lt.s32.totalorder %v699_v9, %v304_v13 }
  0xb3   :  { %vm308_vm4 = vmand %vm302_vm2, %vm306_vm3 }
  0xb4   :  { %v227_v3 = vadd.f32 %v217_v0, %v216_v63  ;;  %600 = vmatpush.msk.msrb.mxu1 %vm308_vm4, %v636_v15  ;;  %vm307_vm7 = vmand %vm301_vm5, %vm305_vm6  ;;  %246 = vperm.xlu0 %619, %v19_v24  }
  0xb6   :  { %601 = vmatpush.msk.msrb.mxu1 %vm307_vm7, %v636_v15 }
  0xb7   :  { %602 = vmatmul.msk.f32.vlgmr.msrb.gmra.mxu1 %vm313_vm9, %v596_v17 }
  0xb8   :  { %222 = vadd.xlane.f32.xlu2 %v221_v55 }
  0xbf   :  { %603 = vmatmul.msk.f32.gmra.mxu1 %vm313_vm9, %v597_v19 }
  0xc0   :  { %127 = vadd.xlane.f32.xlu2 %v126_v62 }
  0xc7   :  { %251 = vperm.xlu1 %620, %v20_v25  }
  0xc8   :  { %228 = vadd.xlane.f32.xlu2 %v227_v3 }
  0xd0   :  { %219 = vadd.xlane.f32.xlu2 %v218_v6 }
  0xe8   :  { %241 = vperm.xlu2 %618, %v18_v29  }
 0x113   :  { %v134_v27 = vpop.xlane.xlu0 %133 }
 0x114   :  { %v140_v33 = vmul.f32 0.00390625, %v134_v27 }
 0x11b   :  { %v137_v18 = vpop.xlane.xlu2 %136 }
 0x11c   :  { %v141_v30 = vmul.f32 0.00390625, %v137_v18 }
 0x121   :  { %v226_v23 = vpop.xlane.xlu1 %225 }
 0x122   :  { %v232_v31 = vmul.f32 0.00390625, %v226_v23 }
 0x123   :  { %v131_v20 = vpop.xlane.xlu2 %130 }
 0x124   :  { %v139_v36 = vmul.f32 0.00390625, %v131_v20  ;;  %v237_v37 = vsel %vm234_vm11, %v140_v33, %v232_v31 }
 0x126   :  { %v247_v62 = vpop.permute.xlu0 %246 }
 0x12b   :  { %v223_v21 = vpop.xlane.xlu2 %222 }
 0x12c   :  { %v231_v34 = vmul.f32 0.00390625, %v223_v21 }
 0x12e   :  { %v236_v38 = vsel %vm234_vm11, %v139_v36, %v231_v34 }
 0x133   :  { %v128_v22 = vpop.xlane.xlu2 %127 }
 0x134   :  { %v138_v40 = vmul.f32 0.00390625, %v128_v22  ;;  %v722_v43 = vpop.f32.mrf.mxu1 }
 0x135   :  { %v343_v45 = vmin.f32 %v722_v43, 1.0 }
 0x137   :  { %v381_v47 = vsel %vm367_vm13, %v343_v45, 0.0 }
 0x139   :  { %v252_v12 = vpop.permute.xlu1 %251 }
 0x13b   :  { %v229_v28 = vpop.xlane.xlu2 %228 }
 0x13c   :  { %v233_v32 = vmul.f32 0.00390625, %v229_v28  ;;  %v724_v44 = vpop.f32.mrf.mxu1 }
 0x13d   :  { %v344_v46 = vmin.f32 %v724_v44, 1.0 }
 0x13e   :  { %v238_v35 = vsel %vm234_vm11, %v141_v30, %v233_v32 }
 0x13f   :  { %273 = vmatpush.msrb.mxu0 %v238_v35  ;;  %v382_v48 = vsel %vm367_vm13, %v344_v46, 0.0 }
 0x140   :  { %v383_v49 = vadd.f32 %v382_v48, %v381_v47 }
 0x141   :  { %274 = vmatpush.msrb.mxu0 %v237_v37 }
 0x142   :  { %v384_v50 = vrot.slane %v383_v49, 4 }
 0x143   :  { %275 = vmatpush.msrb.mxu0 %v236_v38  ;;  %v220_v39 = vpop.xlane.xlu2 %219 }
 0x144   :  { %v230_v41 = vmul.f32 0.00390625, %v220_v39  ;;  %v385_v51 = vadd.f32 %v384_v50, %v383_v49 }
 0x146   :  { %v235_v42 = vsel %vm234_vm11, %v138_v40, %v230_v41  ;;  %v386_v52 = vrot.slane %v385_v51, 2 }
 0x147   :  { %276 = vmatpush.msrb.mxu0 %v235_v42 }
 0x148   :  { %593 = vmatmul.msk.f32.vlgmr.msrb.gmra.mxu0 %vm254_vm12, %v18_v29  ;;  %v387_v53 = vadd.f32 %v386_v52, %v385_v51 }
 0x14a   :  { %v388_v54 = vrot.slane %v387_v53, 1 }
 0x14b   :  { %v242_v55 = vpop.permute.xlu2 %241 }
 0x14c   :  { %v389_v58 = vadd.f32 %v388_v54, %v387_v53 }
 0x14e   :  { %v604_v61 = vadd.f32 -1.0, %v389_v58 }
 0x150   :  { %594 = vmatmul.msk.f32.gmra.mxu0 %vm254_vm12, %v19_v24  ;;  %v607_v2 = vceil.f32 %v604_v61  ;;  %v608_v3 = vfloor.f32 %v604_v61  ;;  %vm606_vm14 = vcmp.lt.s32.totalorder %v604_v61, 0 }
 0x152   :  { %v609_v14 = vsel %vm606_vm14, %v607_v2, %v608_v3 }
 0x153   :  { %v610_v21 = vcvt.f32.s32 %v609_v14 }
 0x155   :  { %vm392_vm1 = vcmp.gt.s32.totalorder %v610_v21, 0 }
 0x156   :  { %v393_v31 = vsel %vm392_vm1, %v610_v21, 0 }
 0x157   :  { %vm394_vm4 = vcmp.lt.s32.totalorder %v393_v31, 3 }
 0x158   :  { %595 = vmatmul.msk.f32.gmra.mxu0 %vm254_vm12, %v20_v25  ;;  %v395_v51 = vsel %vm394_vm4, %v393_v31, 3  ;;  %vm553_vm4 = vcmask 1040384  }
 0x159   :  { %vm417_vm7 = vcmp.eq.s32.totalorder %v699_v9, %v395_v51 }
 0x1c5   :  { %v278_v56 = vpop.f32.mrf.mxu0 }
 0x1c6   :  { %v732_v57 = vadd.f32 %v278_v56, %v242_v55 }
 0x1c8   :  { %v351_v59 = vand.u32 2147483647, %v732_v57  ;;  %v431_v4 = vsel %vm367_vm13, %v732_v57, -inf  ;;  %v345_v34 = vmax.f32 %v732_v57, 0.0  ;;  %v347_v35 = vmul.f32 %v343_v45, %v732_v57 }
 0x1ca   :  { %v353_v60 = vsub.f32 0.0, %v351_v59  ;;  %v349_v48 = vsub.f32 %v345_v34, %v347_v35 }
 0x1cc   :  { %v355_v63 = vmul.f32 1.442695, %v353_v60 }
 0x1cd   :  { %v281_v0 = vpop.f32.mrf.mxu0 }
 0x1ce   :  { %v735_v1 = vadd.f32 %v281_v0, %v247_v62  ;;  %623 = vpow2.f32 %v355_v63 }
 0x1d0   :  { %v352_v5 = vand.u32 2147483647, %v735_v1  ;;  %v432_v6 = vsel %vm367_vm13, %v735_v1, -inf  ;;  %v346_v41 = vmax.f32 %v735_v1, 0.0  ;;  %v348_v42 = vmul.f32 %v344_v46, %v735_v1 }
 0x1d1   :  { %v433_v7 = vmax.f32 %v431_v4, %v432_v6 }
 0x1d2   :  { %v354_v8 = vsub.f32 0.0, %v352_v5  ;;  %v350_v53 = vsub.f32 %v346_v41, %v348_v42 }
 0x1d3   :  { %v434_v10 = vrot.slane %v433_v7, 4 }
 0x1d4   :  { %v624_v13 = vpop.eup %623  ;;  %v357_v15 = vmul.f32 1.442695, %v354_v8 }
 0x1d5   :  { %v435_v16 = vmax.f32 %v433_v7, %v434_v10  ;;  %v284_v17 = vpop.f32.mrf.mxu0  ;;  %v359_v18 = vadd.f32 1.0, %v624_v13 }
 0x1d6   :  { %v285_v19 = vadd.f32 %v284_v17, %v252_v12  ;;  %625 = vpow2.f32 %v357_v15 }
 0x1d7   :  { %v436_v20 = vrot.slane %v435_v16, 2  ;;  %627 = vlog2.f32 %v359_v18 }
 0x1d8   :  { %v397_v22 = vsel %vm396_vm15, %v285_v19, -inf  ;;  %v418_v63 = vsel %vm417_vm7, %v285_v19, 0.0 }
 0x1d9   :  { %v437_v23 = vmax.f32 %v435_v16, %v436_v20  ;;  %v398_v24 = vrot.slane %v397_v22, 4  ;;  %v419_v4 = vsel %vm396_vm15, %v418_v63, 0.0 }
 0x1da   :  { %v420_v14 = vrot.slane %v419_v4, 4 }
 0x1db   :  { %v438_v25 = vrot.slane %v437_v23, 1  ;;  %v399_v26 = vmax.f32 %v397_v22, %v398_v24 }
 0x1dc   :  { %v626_v27 = vpop.eup %625 }
 0x1dd   :  { %v439_v28 = vmax.f32 %v437_v23, %v438_v25  ;;  %v400_v29 = vrot.slane %v399_v26, 2  ;;  %v360_v30 = vadd.f32 1.0, %v626_v27  ;;  %v628_v32 = vpop.eup %627  ;;  %v421_v23 = vadd.f32 %v420_v14, %v419_v4 }
 0x1de   :  { %v362_v43 = vmul.f32 0.6931472, %v628_v32 }
 0x1df   :  { %vm441_vm2 = vcmp.eq.f32.partialorder %v735_v1, %v439_v28  ;;  %v401_v33 = vmax.f32 %v399_v26, %v400_v29  ;;  %629 = vlog2.f32 %v360_v30  ;;  %vm440_vm3 = vcmp.eq.f32.partialorder %v732_v57, %v439_v28 }
 0x1e0   :  { %v442_v36 = vsel %vm440_vm3, %v699_v9, 16  ;;  %v443_v37 = vsel %vm441_vm2, %v702_v11, 16  ;;  %v365_v55 = vadd.f32 %v362_v43, %v349_v48 }
 0x1e1   :  { %v402_v38 = vrot.slane %v401_v33, 1  ;;  %v444_v39 = vsel %vm367_vm13, %v442_v36, 2147483647  ;;  %v445_v40 = vsel %vm367_vm13, %v443_v37, 2147483647 }
 0x1e2   :  { %vm446_vm5 = vcmp.lt.s32.totalorder %v444_v39, %v445_v40  ;;  %v368_v46 = vsel %vm367_vm13, %v365_v55, 0.0 }
 0x1e3   :  { %v755_v47 = vmax.f32 %v401_v33, %v402_v38  ;;  %v447_v45 = vsel %vm446_vm5, %v444_v39, %v445_v40 }
 0x1e4   :  { %v448_v49 = vrot.slane %v447_v45, 4 }
 0x1e5   :  { %v630_v50 = vpop.eup %629  ;;  %v404_v52 = vsub.f32 %v285_v19, %v755_v47 }
 0x1e6   :  { %v364_v54 = vmul.f32 0.6931472, %v630_v50  ;;  %vm449_vm6 = vcmp.lt.s32.totalorder %v447_v45, %v448_v49 }
 0x1e7   :  { %v405_v56 = vmul.f32 1.442695, %v404_v52  ;;  %v450_v58 = vsel %vm449_vm6, %v447_v45, %v448_v49 }
 0x1e8   :  { %v366_v59 = vadd.f32 %v364_v54, %v350_v53  ;;  %v451_v44 = vrot.slane %v450_v58, 2 }
 0x1e9   :  { %631 = vpow2.f32 %v405_v56 }
 0x1ea   :  { %v369_v60 = vsel %vm367_vm13, %v366_v59, 0.0  ;;  %vm452_vm8 = vcmp.lt.s32.totalorder %v450_v58, %v451_v44 }
 0x1eb   :  { %v370_v61 = vadd.f32 %v369_v60, %v368_v46  ;;  %v453_v62 = vsel %vm452_vm8, %v450_v58, %v451_v44 }
 0x1ec   :  { %v454_v0 = vrot.slane %v453_v62, 1 }
 0x1ed   :  { %v371_v2 = vrot.slane %v370_v61, 4 }
 0x1ee   :  { %vm455_vm9 = vcmp.lt.s32.totalorder %v453_v62, %v454_v0 }
 0x1ef   :  { %v632_v3 = vpop.eup %631  ;;  %v372_v5 = vadd.f32 %v371_v2, %v370_v61  ;;  %v762_v6 = vsel %vm455_vm9, %v453_v62, %v454_v0 }
 0x1f0   :  { %v407_v7 = vsel %vm396_vm15, %v632_v3, 0.0  ;;  %vm457_vm10 = vcmp.eq.s32.totalorder %v699_v9, %v762_v6  ;;  %vm458_vm11 = vcmp.eq.s32.totalorder %v702_v11, %v762_v6 }
 0x1f1   :  { %v408_v8 = vrot.slane %v407_v7, 4  ;;  %v373_v10 = vrot.slane %v372_v5, 2  ;;  %v459_v12 = vsel %vm457_vm10, -1e+30, %v732_v57  ;;  %v460_v13 = vsel %vm458_vm11, -1e+30, %v735_v1 }
 0x1f2   :  { %v461_v15 = vsel %vm367_vm13, %v459_v12, -inf  ;;  %v462_v16 = vsel %vm367_vm13, %v460_v13, -inf  ;;  %v422_v1 = vrot.slane %v421_v23, 2 }
 0x1f3   :  { %v409_v17 = vadd.f32 %v408_v8, %v407_v7  ;;  %v374_v18 = vadd.f32 %v373_v10, %v372_v5  ;;  %v463_v19 = vmax.f32 %v461_v15, %v462_v16 }
 0x1f4   :  { %v423_v32 = vadd.f32 %v422_v1, %v421_v23 }
 0x1f5   :  { %v410_v20 = vrot.slane %v409_v17, 2  ;;  %v375_v21 = vrot.slane %v374_v18, 1  ;;  %v464_v22 = vrot.slane %v463_v19, 4 }
 0x1f6   :  { %v424_v34 = vrot.slane %v423_v32, 1 }
 0x1f7   :  { %v376_v24 = vadd.f32 %v375_v21, %v374_v18  ;;  %v411_v25 = vadd.f32 %v410_v20, %v409_v17  ;;  %v465_v26 = vmax.f32 %v463_v19, %v464_v22 }
 0x1f8   :  { %v425_v43 = vadd.f32 %v424_v34, %v423_v32 }
 0x1f9   :  { %v377_v27 = vsel %vm367_vm13, %v376_v24, 0.0  ;;  %v412_v57 = vrot.slane %v411_v25, 1  ;;  %v466_v28 = vrot.slane %v465_v26, 2 }
 0x1fa   :  { %378 = vadd.xlane.f32.xlu2 %v377_v27 }
 0x1fb   :  { %v413_v29 = vadd.f32 %v412_v57, %v411_v25  ;;  %v467_v30 = vmax.f32 %v465_v26, %v466_v28 }
 0x1fd   :  { %633 = vlog2.f32 %v413_v29  ;;  %v468_v31 = vrot.slane %v467_v30, 1 }
 0x1ff   :  { %v469_v33 = vmax.f32 %v467_v30, %v468_v31 }
 0x201   :  { %vm470_vm12 = vcmp.eq.f32.partialorder %v459_v12, %v469_v33  ;;  %vm471_vm14 = vcmp.eq.f32.partialorder %v460_v13, %v469_v33  ;;  %vm487_vm5 = vcmp.gt.f32.partialorder %v469_v33, 0.0 }
 0x202   :  { %v472_v35 = vsel %vm470_vm12, %v699_v9, 16  ;;  %v473_v36 = vsel %vm471_vm14, %v702_v11, 16 }
 0x203   :  { %v634_v37 = vpop.eup %633  ;;  %v474_v38 = vsel %vm367_vm13, %v472_v35, 2147483647  ;;  %v475_v39 = vsel %vm367_vm13, %v473_v36, 2147483647 }
 0x204   :  { %v415_v40 = vmul.f32 0.6931472, %v634_v37  ;;  %vm476_vm15 = vcmp.lt.s32.totalorder %v474_v38, %v475_v39 }
 0x205   :  { %v477_v41 = vsel %vm476_vm15, %v474_v38, %v475_v39  ;;  %vm555_vm15 = vcmask 1041408  }
 0x206   :  { %v416_v42 = vadd.f32 %v415_v40, %v755_v47  ;;  %v478_v45 = vrot.slane %v477_v41, 4 }
 0x208   :  { %v426_v48 = vsub.f32 %v416_v42, %v425_v43  ;;  %vm479_vm1 = vcmp.lt.s32.totalorder %v477_v41, %v478_v45 }
 0x209   :  { %v480_v49 = vsel %vm479_vm1, %v477_v41, %v478_v45 }
 0x20a   :  { %v427_v50 = vsel %vm367_vm13, %v426_v48, 0.0  ;;  %v481_v51 = vrot.slane %v480_v49, 2 }
 0x20b   :  { %428 = vadd.xlane.f32.xlu1 %v427_v50 }
 0x20c   :  { %vm482_vm2 = vcmp.lt.s32.totalorder %v480_v49, %v481_v51 }
 0x20d   :  { %v483_v52 = vsel %vm482_vm2, %v480_v49, %v481_v51 }
 0x20e   :  { %v484_v53 = vrot.slane %v483_v52, 1 }
 0x210   :  { %vm485_vm3 = vcmp.lt.s32.totalorder %v483_v52, %v484_v53 }
 0x211   :  { %v486_v54 = vsel %vm485_vm3, %v483_v52, %v484_v53 }
 0x212   :  { %v488_v55 = vsel %vm487_vm5, %v486_v54, 16  ;;  %vm489_vm6 = vcmp.eq.s32.totalorder %v699_v9, %v486_v54  ;;  %vm490_vm7 = vcmp.eq.s32.totalorder %v702_v11, %v486_v54 }
 0x213   :  { %v491_v47 = vsel %vm489_vm6, -1e+30, %v459_v12  ;;  %v492_v56 = vsel %vm490_vm7, -1e+30, %v460_v13  ;;  %v554_v58 = vsel %vm553_vm4, %v762_v6, %v488_v55 }
 0x214   :  { %v493_v59 = vsel %vm367_vm13, %v491_v47, -inf  ;;  %v494_v44 = vsel %vm367_vm13, %v492_v56, -inf }
 0x215   :  { %v495_v46 = vmax.f32 %v493_v59, %v494_v44 }
 0x217   :  { %v496_v60 = vrot.slane %v495_v46, 4 }
 0x219   :  { %v497_v61 = vmax.f32 %v495_v46, %v496_v60 }
 0x21b   :  { %v498_v62 = vrot.slane %v497_v61, 2 }
 0x21d   :  { %v499_v63 = vmax.f32 %v497_v61, %v498_v62 }
 0x21f   :  { %v500_v0 = vrot.slane %v499_v63, 1 }
 0x221   :  { %v501_v2 = vmax.f32 %v499_v63, %v500_v0 }
 0x223   :  { %vm502_vm8 = vcmp.eq.f32.partialorder %v491_v47, %v501_v2  ;;  %vm503_vm9 = vcmp.eq.f32.partialorder %v492_v56, %v501_v2  ;;  %vm519_vm1 = vcmp.gt.f32.partialorder %v501_v2, 0.0 }
 0x224   :  { %v504_v3 = vsel %vm502_vm8, %v699_v9, 16  ;;  %v505_v4 = vsel %vm503_vm9, %v702_v11, 16 }
 0x225   :  { %v506_v5 = vsel %vm367_vm13, %v504_v3, 2147483647  ;;  %v507_v6 = vsel %vm367_vm13, %v505_v4, 2147483647 }
 0x226   :  { %vm508_vm10 = vcmp.lt.s32.totalorder %v506_v5, %v507_v6 }
 0x227   :  { %v509_v7 = vsel %vm508_vm10, %v506_v5, %v507_v6 }
 0x228   :  { %v510_v8 = vrot.slane %v509_v7, 4 }
 0x22a   :  { %vm511_vm11 = vcmp.lt.s32.totalorder %v509_v7, %v510_v8 }
 0x22b   :  { %v512_v10 = vsel %vm511_vm11, %v509_v7, %v510_v8  ;;  %vm557_vm11 = vcmask 1042432  }
 0x22c   :  { %v513_v12 = vrot.slane %v512_v10, 2 }
 0x22e   :  { %vm514_vm12 = vcmp.lt.s32.totalorder %v512_v10, %v513_v12 }
 0x22f   :  { %v515_v13 = vsel %vm514_vm12, %v512_v10, %v513_v12 }
 0x230   :  { %v516_v14 = vrot.slane %v515_v13, 1 }
 0x232   :  { %vm517_vm14 = vcmp.lt.s32.totalorder %v515_v13, %v516_v14 }
 0x233   :  { %v518_v15 = vsel %vm517_vm14, %v515_v13, %v516_v14 }
 0x234   :  { %v520_v16 = vsel %vm519_vm1, %v518_v15, 16  ;;  %vm521_vm2 = vcmp.eq.s32.totalorder %v699_v9, %v518_v15  ;;  %vm522_vm3 = vcmp.eq.s32.totalorder %v702_v11, %v518_v15 }
 0x235   :  { %v523_v17 = vsel %vm521_vm2, -1e+30, %v491_v47  ;;  %v524_v18 = vsel %vm522_vm3, -1e+30, %v492_v56  ;;  %v556_v19 = vsel %vm555_vm15, %v554_v58, %v520_v16 }
 0x236   :  { %v525_v20 = vsel %vm367_vm13, %v523_v17, -inf  ;;  %v526_v21 = vsel %vm367_vm13, %v524_v18, -inf }
 0x237   :  { %v527_v22 = vmax.f32 %v525_v20, %v526_v21 }
 0x239   :  { %v528_v23 = vrot.slane %v527_v22, 4 }
 0x23b   :  { %v529_v24 = vmax.f32 %v527_v22, %v528_v23 }
 0x23d   :  { %v530_v25 = vrot.slane %v529_v24, 2 }
 0x23f   :  { %v531_v26 = vmax.f32 %v529_v24, %v530_v25 }
 0x241   :  { %v532_v27 = vrot.slane %v531_v26, 1 }
 0x243   :  { %v533_v57 = vmax.f32 %v531_v26, %v532_v27 }
 0x245   :  { %vm534_vm5 = vcmp.eq.f32.partialorder %v523_v17, %v533_v57  ;;  %vm535_vm6 = vcmp.eq.f32.partialorder %v524_v18, %v533_v57  ;;  %vm551_vm12 = vcmp.gt.f32.partialorder %v533_v57, 0.0 }
 0x246   :  { %v536_v28 = vsel %vm534_vm5, %v699_v9, 16  ;;  %v537_v1 = vsel %vm535_vm6, %v702_v11, 16  ;;  %v639_v11 = vmov 0  }
 0x247   :  { %v538_v29 = vsel %vm367_vm13, %v536_v28, 2147483647  ;;  %v539_v30 = vsel %vm367_vm13, %v537_v1, 2147483647  ;;  %621 = vset.pattern.permute.xlu0 %v639_v11  ;;  %vm566_vm13 = vcmask 13312  }
 0x248   :  { %vm540_vm7 = vcmp.lt.s32.totalorder %v538_v29, %v539_v30 }
 0x249   :  { %v541_v31 = vsel %vm540_vm7, %v538_v29, %v539_v30 }
 0x24a   :  { %v542_v32 = vrot.slane %v541_v31, 4 }
 0x24c   :  { %vm543_vm8 = vcmp.lt.s32.totalorder %v541_v31, %v542_v32 }
 0x24d   :  { %v544_v33 = vsel %vm543_vm8, %v541_v31, %v542_v32 }
 0x24e   :  { %v545_v34 = vrot.slane %v544_v33, 2 }
 0x250   :  { %vm546_vm9 = vcmp.lt.s32.totalorder %v544_v33, %v545_v34 }
 0x251   :  { %v547_v35 = vsel %vm546_vm9, %v544_v33, %v545_v34 }
 0x252   :  { %v548_v36 = vrot.slane %v547_v35, 1 }
 0x254   :  { %vm549_vm10 = vcmp.lt.s32.totalorder %v547_v35, %v548_v36 }
 0x255   :  { %v550_v37 = vsel %vm549_vm10, %v547_v35, %v548_v36 }
 0x256   :  { %v552_v9 = vsel %vm551_vm12, %v550_v37, 16 }
 0x257   :  { %v558_v38 = vsel %vm557_vm11, %v556_v19, %v552_v9 }
 0x26d   :  { %v379_v39 = vpop.xlane.xlu2 %378 }
 0x26e   :  { %v380_v41 = vmul.f32 0.03125, %v379_v39 }
 0x27e   :  { %v429_v40 = vpop.xlane.xlu1 %428 }
 0x27f   :  { %v430_v42 = vmul.f32 0.5, %v429_v40 }
 0x281   :  { %v559_v43 = vsel %vm553_vm4, %v380_v41, %v430_v42 }
 0x282   :  { %562 = vperm.xlu0 %621, %v559_v43  }
 0x2f4   :  { %v563_v45 = vpop.permute.xlu0 %562 }
 0x2f5   :  { %v564_v48 = vrot.slane %v563_v45, 4 }
 0x2f7   :  { %v565_v49 = vsel %vm55_vm0, %v558_v38, %v564_v48 }
 0x2f8   :  { %567 = vst.msk [vmem:[%s806_s3] sm:$0x3f] %vm566_vm13, %v565_v49 }

</bundles_post_ra>
